<compile_context>
chip_gen: v7x
topology: tpu7x:2x2x1
jax: 0.10.0
libtpu: 0.0.40
codegen_flags: <defaults>
</compile_context>

<pallas_src>
import jax
import jax.numpy as jnp
from jax.experimental import pallas as pl
from jax.experimental.pallas import tpu as pltpu

HIDDEN1 = 32
HIDDEN2 = 64
OUT_DIM = 1


def _mlp_kernel(x_ref, w1t_ref, b1_ref, w2t_ref, b2_ref, w3t_ref, b3_ref, o_ref):
    # x_ref:   (TB, D)      f32  (cast to bf16 in-kernel, on the VPU)
    # w1t_ref: (H1, D)      bf16    b1_ref: (H1, 1) f32
    # w2t_ref: (H2, H1)     bf16    b2_ref: (H2, 1) f32
    # w3t_ref: (1, H2)      bf16    b3_ref: (1, 1)  f32 (SMEM scalar)
    # o_ref:   (1, TB)      f32  lane-dense probability row
    x = x_ref[...].astype(jnp.bfloat16)

    # fc1 + ReLU, batch-on-lanes: contract D of (H1, D) with D of (TB, D)
    # -> (H1, TB).  Same A @ B.T pattern the MXU handles natively.
    h1 = jax.lax.dot_general(
        w1t_ref[...], x,
        dimension_numbers=(((1,), (1,)), ((), ())),
        preferred_element_type=jnp.float32,
    )
    h1 = jnp.maximum(h1 + b1_ref[...], 0.0)                      # (H1, TB)

    # fc2 + ReLU: (H2, H1) @ (H1, TB) -> (H2, TB); TB stays on the lanes.
    h2 = jnp.dot(w2t_ref[...], h1.astype(jnp.bfloat16),
                 preferred_element_type=jnp.float32)
    h2 = jnp.maximum(h2 + b2_ref[...], 0.0)                      # (H2, TB)

    # fc3: (1, H2) @ (H2, TB) -> (1, TB); output is already lane-dense.
    logits = jnp.dot(w3t_ref[...], h2.astype(jnp.bfloat16),
                     preferred_element_type=jnp.float32)
    logits = logits + b3_ref[0, 0]

    # Sigmoid via EUP exp + approximate reciprocal (keeps the VALU free).
    o_ref[...] = pl.reciprocal(1.0 + jnp.exp(-logits), approx=True)


def _round_up(n, m):
    return ((n + m - 1) // m) * m


def _pick_batch_tile(batch, block_b):
    """Pick (tile, padded_batch).  Multi-tile lane-dense output blocks must be
    multiples of 128; single-tile blocks only need sublane (x8) alignment."""
    b8 = max(8, _round_up(batch, 8))
    if b8 <= block_b:
        # Split into 2 tiles when big enough so v7x's two TensorCores both
        # get work (tiles must stay 128-aligned for the lane-dense out block).
        if b8 >= 4096 and b8 % 256 == 0:
            return b8 // 2, b8
        return b8, b8
    # Multi-tile: prefer a 128-aligned tile that divides the batch exactly,
    # so no full-array pad pass over x is needed.
    if batch % 128 == 0:
        for tb in range(block_b - block_b % 128, 127, -128):
            if batch % tb == 0:
                return tb, batch
    # TODO(synk): ragged large batches fall back to padding the whole array;
    # a per-remainder second pallas_call would avoid that extra HBM pass.
    tb = block_b
    return tb, _round_up(batch, tb)


def prepare_params(w1, b1, w2, b2, w3, b3):
    """One-time layout/dtype prep of the weights (hoisted out of the forward)."""
    return (
        w1.T.astype(jnp.bfloat16),                       # (H1, D)
        b1.reshape(HIDDEN1, 1).astype(jnp.float32),      # (H1, 1)
        w2.T.astype(jnp.bfloat16),                       # (H2, H1)
        b2.reshape(HIDDEN2, 1).astype(jnp.float32),      # (H2, 1)
        w3.T.astype(jnp.bfloat16),                       # (1, H2)
        b3.reshape(1, 1).astype(jnp.float32),            # (1, 1) SMEM scalar
    )


def mlp_forward(x, prepared_params, *, block_b=8192):
    """x: (B, D) float32 -> (B, 1) float32 probabilities."""
    w1t, b1c, w2t, b2c, w3t, b3s = prepared_params
    B, D = x.shape

    tb, b_pad = _pick_batch_tile(B, block_b)
    if b_pad != B:
        x = jnp.pad(x, ((0, b_pad - B), (0, 0)))
    n_tiles = b_pad // tb

    flops = 2 * b_pad * (D * HIDDEN1 + HIDDEN1 * HIDDEN2 + HIDDEN2 * OUT_DIM)
    bytes_accessed = (
        b_pad * (D + 1) * 4
        + 2 * (D * HIDDEN1 + HIDDEN1 * HIDDEN2 + HIDDEN2 * OUT_DIM)
        + 4 * (HIDDEN1 + HIDDEN2 + OUT_DIM)
    )

    out_row = pl.pallas_call(
        _mlp_kernel,
        out_shape=jax.ShapeDtypeStruct((1, b_pad), jnp.float32),
        grid=(n_tiles,),
        in_specs=[
            pl.BlockSpec((tb, D), lambda i: (i, 0)),               # x batch tile (f32)
            pl.BlockSpec((HIDDEN1, D), lambda i: (0, 0)),          # W1^T (resident)
            pl.BlockSpec((HIDDEN1, 1), lambda i: (0, 0)),          # b1
            pl.BlockSpec((HIDDEN2, HIDDEN1), lambda i: (0, 0)),    # W2^T (resident)
            pl.BlockSpec((HIDDEN2, 1), lambda i: (0, 0)),          # b2
            pl.BlockSpec((1, HIDDEN2), lambda i: (0, 0)),          # W3^T (resident)
            pl.BlockSpec(memory_space=pltpu.MemorySpace.SMEM),     # b3 scalar
        ],
        out_specs=pl.BlockSpec((1, tb), lambda i: (0, i)),         # lane-dense out
        compiler_params=pltpu.CompilerParams(
            dimension_semantics=("parallel",),
            vmem_limit_bytes=32 * 1024 * 1024,
        ),
        cost_estimate=pl.CostEstimate(
            flops=flops,
            transcendentals=b_pad,
            bytes_accessed=bytes_accessed,
        ),
    )(x, w1t, b1c, w2t, b2c, w3t, b3s)

    return out_row[0, :B].reshape(B, OUT_DIM)


def init_params(input_dimensions: int, key):
    """Deterministic init mimicking PyTorch Linear's U(-1/sqrt(fan_in), +1/sqrt(fan_in))."""
    ks = jax.random.split(key, 6)

    def linear(kw, kb, fan_in, fan_out):
        bound = 1.0 / jnp.sqrt(jnp.float32(fan_in))
        w = jax.random.uniform(kw, (fan_in, fan_out), jnp.float32, -bound, bound)
        b = jax.random.uniform(kb, (fan_out,), jnp.float32, -bound, bound)
        return w, b

    w1, b1 = linear(ks[0], ks[1], input_dimensions, HIDDEN1)
    w2, b2 = linear(ks[2], ks[3], HIDDEN1, HIDDEN2)
    w3, b3 = linear(ks[4], ks[5], HIDDEN2, OUT_DIM)
    return w1, b1, w2, b2, w3, b3


def reference_forward(x, w1, b1, w2, b2, w3, b3):
    # Mirrors the kernel's bf16-input / f32-accumulation numerics.
    def q(a):
        return a.astype(jnp.bfloat16).astype(jnp.float32)

    h1 = jnp.maximum(q(x) @ q(w1) + b1, 0.0)
    h2 = jnp.maximum(q(h1) @ q(w2) + b2, 0.0)
    logits = q(h2) @ q(w3) + b3
    return jax.nn.sigmoid(logits)


if __name__ == "__main__":
    key = jax.random.PRNGKey(0)
    k_x, k_p = jax.random.split(key)

    batch = 8
    input_dimensions = 16
    x = jax.random.normal(k_x, (batch, input_dimensions), jnp.float32)

    raw_params = init_params(input_dimensions, k_p)
    prepared = prepare_params(*raw_params)

    y = mlp_forward(x, prepared)
    y = jax.block_until_ready(y)

    y_ref = reference_forward(x, *raw_params)
    assert y.shape == (batch, OUT_DIM)
    assert jnp.allclose(y, y_ref, atol=5e-3, rtol=5e-3)

    # TODO(synk): model_train (BCELoss + SGD loop) is host-side training logic,
    # not part of the forward pass, and is intentionally not ported to Pallas.

    print("KERNEL_OK")
</pallas_src>

<mosaic_0001>
module attributes {stable_mosaic.version = 11 : i64} {
  func.func @_mlp_kernel(%arg0: i32, %arg1: memref<8x16xf32, #tpu.memory_space<vmem>>, %arg2: memref<32x16xbf16, #tpu.memory_space<vmem>>, %arg3: memref<32x1xf32, #tpu.memory_space<vmem>>, %arg4: memref<64x32xbf16, #tpu.memory_space<vmem>>, %arg5: memref<64x1xf32, #tpu.memory_space<vmem>>, %arg6: memref<1x64xbf16, #tpu.memory_space<vmem>>, %arg7: memref<1x1xf32, #tpu.memory_space<smem>>, %arg8: memref<1x8xf32, #tpu.memory_space<vmem>>) attributes {dimension_semantics = [#tpu.dimension_semantics<parallel>], iteration_bounds = array<i64: 1>, scalar_prefetch = 0 : i64, scratch_operands = 0 : i64, tpu.core_type = #tpu.core_type<tc>, window_params = [{transform_indices = @transform_0, window_bounds = array<i64: 8, 16>}, {pipeline_mode = #tpu.pipeline_mode<synchronous>, transform_indices = @transform_1, window_bounds = array<i64: 32, 16>}, {pipeline_mode = #tpu.pipeline_mode<synchronous>, transform_indices = @transform_2, window_bounds = array<i64: 32, 1>}, {pipeline_mode = #tpu.pipeline_mode<synchronous>, transform_indices = @transform_3, window_bounds = array<i64: 64, 32>}, {pipeline_mode = #tpu.pipeline_mode<synchronous>, transform_indices = @transform_4, window_bounds = array<i64: 64, 1>}, {pipeline_mode = #tpu.pipeline_mode<synchronous>, transform_indices = @transform_5, window_bounds = array<i64: 1, 64>}, {transform_indices = @transform_6, window_bounds = array<i64: 1, 1>}, {transform_indices = @transform_7, window_bounds = array<i64: 1, 8>}]} {
    %c0 = arith.constant 0 : index
    %c0_0 = arith.constant 0 : index
    %0 = vector.load %arg1[%c0, %c0_0] : memref<8x16xf32, #tpu.memory_space<vmem>>, vector<8x16xf32>
    %1 = arith.truncf %0 : vector<8x16xf32> to vector<8x16xbf16>
    %c0_1 = arith.constant 0 : index
    %c0_2 = arith.constant 0 : index
    %2 = vector.load %arg2[%c0_1, %c0_2] : memref<32x16xbf16, #tpu.memory_space<vmem>>, vector<32x16xbf16>
    %cst = arith.constant dense<0.000000e+00> : vector<32x8xf32>
    %3 = tpu.matmul %2, %1, %cst {dimension_numbers = #tpu.dot_dimension_numbers<[1], [1], [0], [0], [0, 0, 1, 0], [], []>} : vector<32x16xbf16>, vector<8x16xbf16>, vector<32x8xf32> -> vector<32x8xf32>
    %c0_3 = arith.constant 0 : index
    %c0_4 = arith.constant 0 : index
    %4 = vector.load %arg3[%c0_3, %c0_4] : memref<32x1xf32, #tpu.memory_space<vmem>>, vector<32x1xf32>
    %5 = vector.broadcast %4 : vector<32x1xf32> to vector<32x8xf32>
    %6 = arith.addf %3, %5 : vector<32x8xf32>
    %cst_5 = arith.constant 0.000000e+00 : f32
    %7 = vector.broadcast %cst_5 : f32 to vector<32x8xf32>
    %8 = arith.maximumf %6, %7 : vector<32x8xf32>
    %c0_6 = arith.constant 0 : index
    %c0_7 = arith.constant 0 : index
    %9 = vector.load %arg4[%c0_6, %c0_7] : memref<64x32xbf16, #tpu.memory_space<vmem>>, vector<64x32xbf16>
    %10 = arith.truncf %8 : vector<32x8xf32> to vector<32x8xbf16>
    %cst_8 = arith.constant dense<0.000000e+00> : vector<64x8xf32>
    %11 = tpu.matmul %9, %10, %cst_8 {dimension_numbers = #tpu.dot_dimension_numbers<[1], [0], [0], [1], [0, 0, 1, 1], [], []>} : vector<64x32xbf16>, vector<32x8xbf16>, vector<64x8xf32> -> vector<64x8xf32>
    %c0_9 = arith.constant 0 : index
    %c0_10 = arith.constant 0 : index
    %12 = vector.load %arg5[%c0_9, %c0_10] : memref<64x1xf32, #tpu.memory_space<vmem>>, vector<64x1xf32>
    %13 = vector.broadcast %12 : vector<64x1xf32> to vector<64x8xf32>
    %14 = arith.addf %11, %13 : vector<64x8xf32>
    %cst_11 = arith.constant 0.000000e+00 : f32
    %15 = vector.broadcast %cst_11 : f32 to vector<64x8xf32>
    %16 = arith.maximumf %14, %15 : vector<64x8xf32>
    %c0_12 = arith.constant 0 : index
    %c0_13 = arith.constant 0 : index
    %17 = vector.load %arg6[%c0_12, %c0_13] : memref<1x64xbf16, #tpu.memory_space<vmem>>, vector<1x64xbf16>
    %18 = arith.truncf %16 : vector<64x8xf32> to vector<64x8xbf16>
    %cst_14 = arith.constant dense<0.000000e+00> : vector<1x8xf32>
    %19 = tpu.matmul %17, %18, %cst_14 {dimension_numbers = #tpu.dot_dimension_numbers<[1], [0], [0], [1], [0, 0, 1, 1], [], []>} : vector<1x64xbf16>, vector<64x8xbf16>, vector<1x8xf32> -> vector<1x8xf32>
    %c0_15 = arith.constant 0 : index
    %c0_16 = arith.constant 0 : index
    %20 = memref.load %arg7[%c0_15, %c0_16] : memref<1x1xf32, #tpu.memory_space<smem>>
    %21 = vector.broadcast %20 : f32 to vector<1x8xf32>
    %22 = arith.addf %19, %21 : vector<1x8xf32>
    %cst_17 = arith.constant 0.000000e+00 : f32
    %23 = vector.broadcast %cst_17 : f32 to vector<1x8xf32>
    %24 = arith.subf %23, %22 : vector<1x8xf32>
    %25 = math.exp %24 : vector<1x8xf32>
    %cst_18 = arith.constant 1.000000e+00 : f32
    %26 = vector.broadcast %cst_18 : f32 to vector<1x8xf32>
    %27 = arith.addf %26, %25 : vector<1x8xf32>
    %28 = tpu.reciprocal %27 {approx = true} : vector<1x8xf32> -> vector<1x8xf32>
    %c0_19 = arith.constant 0 : index
    %c0_20 = arith.constant 0 : index
    %29 = vector.load %arg8[%c0_19, %c0_20] : memref<1x8xf32, #tpu.memory_space<vmem>>, vector<1x8xf32>
    tpu.vector_store %arg8[%c0_19, %c0_20], %28 {strides = array<i32>} : memref<1x8xf32, #tpu.memory_space<vmem>>, vector<1x8xf32>,
    return
  }
  func.func @transform_0(%arg0: i32) -> (i32, i32) {
    %c0_i32 = arith.constant 0 : i32
    %c0_i32_0 = arith.constant 0 : i32
    return %arg0, %c0_i32 : i32, i32
  }
  func.func @transform_1(%arg0: i32) -> (i32, i32) {
    %c0_i32 = arith.constant 0 : i32
    %c0_i32_0 = arith.constant 0 : i32
    %c0_i32_1 = arith.constant 0 : i32
    return %c0_i32, %c0_i32_0 : i32, i32
  }
  func.func @transform_2(%arg0: i32) -> (i32, i32) {
    %c0_i32 = arith.constant 0 : i32
    %c0_i32_0 = arith.constant 0 : i32
    %c0_i32_1 = arith.constant 0 : i32
    return %c0_i32, %c0_i32_0 : i32, i32
  }
  func.func @transform_3(%arg0: i32) -> (i32, i32) {
    %c0_i32 = arith.constant 0 : i32
    %c0_i32_0 = arith.constant 0 : i32
    %c0_i32_1 = arith.constant 0 : i32
    return %c0_i32, %c0_i32_0 : i32, i32
  }
  func.func @transform_4(%arg0: i32) -> (i32, i32) {
    %c0_i32 = arith.constant 0 : i32
    %c0_i32_0 = arith.constant 0 : i32
    %c0_i32_1 = arith.constant 0 : i32
    return %c0_i32, %c0_i32_0 : i32, i32
  }
  func.func @transform_5(%arg0: i32) -> (i32, i32) {
    %c0_i32 = arith.constant 0 : i32
    %c0_i32_0 = arith.constant 0 : i32
    %c0_i32_1 = arith.constant 0 : i32
    return %c0_i32, %c0_i32_0 : i32, i32
  }
  func.func @transform_6(%arg0: i32) -> (i32, i32) {
    %c0_i32 = arith.constant 0 : i32
    %c0_i32_0 = arith.constant 0 : i32
    %c0_i32_1 = arith.constant 0 : i32
    return %c0_i32, %c0_i32_0 : i32, i32
  }
  func.func @transform_7(%arg0: i32) -> (i32, i32) {
    %c0_i32 = arith.constant 0 : i32
    %c0_i32_0 = arith.constant 0 : i32
    return %c0_i32, %arg0 : i32, i32
  }
}

</mosaic_0001>

<bundles_post_ra>
// kernel: tpu_custom_call.1
= control target key start
LH: loop header
LB: loop body
LE: loop exit
PB: predicated region body
PF: predicated region fallthrough
CT: control target
= control target key end

     0   :  { %vm69_vm0 = vcmask 130048   ;;  %v466_v3 = vmov 0   ;;  %s593_s0 = inlined_call_operand.vmem [shape: f32[8,16], index: 0, kind: input, shape index: {}]   ;;  %s594_s1 = inlined_call_operand.vmem [shape: bf16[32,16], index: 1, kind: input, shape index: {}]   ;;  %s595_s2 = inlined_call_operand.vmem [shape: f32[32,1], index: 2, kind: input, shape index: {}]   ;;  %s596_s3 = inlined_call_operand.vmem [shape: bf16[64,32], index: 3, kind: input, shape index: {}]   ;;  %s597_s4 = inlined_call_operand.vmem [shape: f32[64,1], index: 4, kind: input, shape index: {}]   ;;  %s598_s5 = inlined_call_operand.vmem [shape: bf16[1,64], index: 5, kind: input, shape index: {}]   ;;  %s599_s6 = inlined_call_operand.<no memory space> [shape: f32[1,1], index: 6, kind: input, shape index: {}]   ;;  %s600_s7 = inlined_call_operand.hbm [shape: f32[1,8], index: 7, kind: output, shape index: {}]  }
   0x1   :  { %v29_v0 = vld [vmem:[%s593_s0] sm:$0xff]  ;;  %430 = vset.pattern.permute.xlu0 %v466_v3  ;;  %431 = vset.pattern.permute.xlu1 %v466_v3  ;;  %v37_v5 = vld [vmem:[%s595_s2 + $0x10] sm:$0xff]  ;;  %v433_v7 = vld [vmem:[%s594_s1 + $0x8] sm:$0xff]  }
   0x2   :  { %v30_v1 = vpack.c.bf16 %v29_v0, %v29_v0  ;;  %v432_v2 = vld [vmem:[%s594_s1] sm:$0xff]   ;;  %51 = vperm.xlu1 %431, %v37_v5   ;;  %v36_v8 = vld [vmem:[%s595_s2 + $0x8] sm:$0xff]  ;;  %v38_v9 = vld [vmem:[%s595_s2 + $0x18] sm:$0xff] }
   0x3   :  { %v35_v4 = vld [vmem:[%s595_s2] sm:$0xff]  ;;  %397 = vmatprep.mubr.msk.bf16.mxu0 %vm69_vm0, %v432_v2 }
   0x4   :  { %425 = vmatprep.subr.msk.bf16.mxu0 %vm69_vm0, %v30_v1  ;;  %v77_v6 = vsel %vm69_vm0, %v30_v1, 0  ;;  %41 = vperm.xlu0 %430, %v35_v4   ;;  %v142_v10 = vld [vmem:[%s597_s4] sm:$0xff] }
   0x5   :  { %396 = vmatpush3.bf16.xpose.msra.mxu0 %v77_v6 }
   0x6   :  { %56 = vperm.xlu1 %431, %v38_v9  }
   0x8   :  { %46 = vperm.xlu0 %430, %v36_v8  }
   0x9   :  { %13 = vsyncpa [#allocation4], 0  ;;  %v143_v11 = vld [vmem:[%s597_s4 + $0x8] sm:$0xff]  ;;  %v144_v12 = vld [vmem:[%s597_s4 + $0x10] sm:$0xff]  ;;  %vm210_vm1 = vcmask 261120   ;;  %v467_v40 = vmov 0.0  }
   0xa   :  { %157 = vperm.xlu1 %431, %v143_v11   ;;  %v145_v13 = vld [vmem:[%s597_s4 + $0x18] sm:$0xff]  ;;  %v146_v14 = vld [vmem:[%s597_s4 + $0x20] sm:$0xff]  ;;  %v147_v15 = vld [vmem:[%s597_s4 + $0x28] sm:$0xff]  ;;  %413 = vmatprep.subr.bf16.mxu0 %v467_v40  ;;  %vm468_vm2 = vmmov 0   ;;  %vm303_vm3 = vcmask 523264   ;;  %s469_s14 = smov [#allocation3]  }
   0xb   :  { %v148_v16 = vld [vmem:[%s597_s4 + $0x30] sm:$0xff]  ;;  %v149_v17 = vld [vmem:[%s597_s4 + $0x38] sm:$0xff]  ;;  %v434_v18 = vld [vmem:[%s596_s3] sm:$0xff]   ;;  %s360_s15 = sshll.u32 %s469_s14, 4  ;;  %vm352_vm4 = vcmask 57344   ;;  %s361_s15 = int_to_ptr.vmem [resolvable:$true] %s360_s15 }
   0xc   :  { %398 = vmatmul.mubr.msk.bf16.vlgmr.msra.gmra.mrb[0].mxu0 %vm69_vm0, %v433_v7  ;;  %152 = vperm.xlu0 %430, %v142_v10   ;;  %v435_v37 = vld [vmem:[%s596_s3 + $0x8] sm:$0xff]   ;;  %v436_v38 = vld [vmem:[%s596_s3 + $0x10] sm:$0xff]   ;;  %v437_v39 = vld [vmem:[%s596_s3 + $0x18] sm:$0xff]   ;;  %p447_p1 = scmp.lt.s32.totalorder %s361_s15, %s361_s15 }
   0xd   :  { %405 = vmatprep.mubr.msk.bf16.mxu1 %vm210_vm1, %v434_v18  ;;  %421 = vmatprep.mubr.msk.bf16.mxu0 %vm468_vm2, %v467_v40 }
   0xe   :  { %167 = vperm.xlu1 %431, %v145_v13   ;;  %v296_v13 = vld [vmem:[%s598_s5] sm:$0x1]  ;;  %s442_s5 = scalar_lea.vmem %s361_s15, 16 }
   0xf   :  { %p443_p0 = scmp.ne.s32.totalorder %s361_s15, %s442_s5 }
  0x10   :  { %162 = vperm.xlu0 %430, %v144_v12  }
  0x12   :  { %177 = vperm.xlu1 %431, %v147_v15  }
  0x14   :  { %172 = vperm.xlu0 %430, %v146_v14   ;;  %v302_v14 = vstv %s599_s6  ;;  %s446_s6 = scalar_lea.vmem %s361_s15, 32 }
  0x15   :  { %p448_p2 = scmp.lt.s32.totalorder %s446_s6, %s442_s5 }
  0x16   :  { %187 = vperm.xlu1 %431, %v149_v17  }
  0x17   :  { %p449_p3 = por %p448_p2, %p447_p1 }
  0x18   :  { %182 = vperm.xlu0 %430, %v148_v16  }
  0x19   :  { %p450_p4 = pnand %p449_p3, %p443_p0 }
  0x81   :  { %v52_v19 = vpop.permute.xlu1 %51 }
  0x83   :  { %v42_v20 = vpop.permute.xlu0 %41 }
  0x85   :  { %v57_v24 = vpop.permute.xlu1 %56 }
  0x87   :  { %v47_v27 = vpop.permute.xlu0 %46 }
  0x89   :  { %v158_v42 = vpop.permute.xlu1 %157 }
  0x8b   :  { %v153_v41 = vpop.permute.xlu0 %152 }
  0x8d   :  { %v168_v44 = vpop.permute.xlu1 %167 }
  0x8f   :  { %v163_v43 = vpop.permute.xlu0 %162 }
  0x91   :  { %v178_v53 = vpop.permute.xlu1 %177 }
  0x93   :  { %v173_v48 = vpop.permute.xlu0 %172 }
  0x95   :  { %v188_v1 = vpop.permute.xlu1 %187 }
  0x97   :  { %v183_v60 = vpop.permute.xlu0 %182 }
  0xdf   :  { %v399_v21 = vpop.f32.mrb[0].mxu0 }
  0xe0   :  { %v122_v22 = vadd.f32 %v399_v21, %v52_v19  ;;  %v113_v23 = vpop.f32.mrb[1].mxu0 }
  0xe1   :  { %v114_v25 = vadd.f32 %v113_v23, %v42_v20  ;;  %v400_v26 = vpop.f32.mrb[2].mxu0 }
  0xe2   :  { %v125_v28 = vadd.f32 %v400_v26, %v57_v24  ;;  %v116_v29 = vpop.f32.mrb[3].mxu0  ;;  %v130_v31 = vmax.f32 %v122_v22, 0.0 }
  0xe3   :  { %v117_v30 = vadd.f32 %v116_v29, %v47_v27  ;;  %v128_v33 = vmax.f32 %v114_v25, 0.0 }
  0xe4   :  { %v131_v32 = vmax.f32 %v125_v28, 0.0 }
  0xe5   :  { %v129_v34 = vmax.f32 %v117_v30, 0.0 }
  0xe6   :  { %v141_v35 = vpack.c.bf16 %v131_v32, %v130_v31 }
  0xe7   :  { %v140_v36 = vpack.c.bf16 %v129_v34, %v128_v33 }
  0xe9   :  { %401 = vmatprep.subr.bf16.mxu1 %v140_v36 }
  0xea   :  { %402 = vmatpush3.bf16.msra.mxu1 %v140_v36 }
  0xeb   :  { %403 = vmatprep.subr.bf16.mxu1 %v141_v35 }
  0xee   :  { %404 = vmatpush3.bf16.msra.mxu1 %v141_v35 }
  0xf1   :  { %406 = vmatmul.mubr.msk.bf16.vlgmr.msra.gmra.mrb[0].mxu1 %vm210_vm1, %v435_v37 }
  0xf2   :  { %409 = vmatprep.mubr.msk.bf16.mxu1 %vm210_vm1, %v436_v38 }
  0xf9   :  { %410 = vmatmul.mubr.msk.bf16.gmra.mrb[4].mxu1 %vm210_vm1, %v437_v39 }
 0x1c4   :  { %v407_v45 = vpop.f32.mrb[0].mxu1 }
 0x1c5   :  { %v266_v46 = vadd.f32 %v407_v45, %v163_v43  ;;  %v257_v47 = vpop.f32.mrb[1].mxu1 }
 0x1c6   :  { %v258_v49 = vadd.f32 %v257_v47, %v153_v41  ;;  %v408_v50 = vpop.f32.mrb[2].mxu1 }
 0x1c7   :  { %v269_v51 = vadd.f32 %v408_v50, %v168_v44  ;;  %v260_v52 = vpop.f32.mrb[3].mxu1  ;;  %v290_v55 = vmax.f32 %v266_v46, 0.0 }
 0x1c8   :  { %v261_v54 = vadd.f32 %v260_v52, %v158_v42  ;;  %v288_v57 = vmax.f32 %v258_v49, 0.0 }
 0x1c9   :  { %v291_v56 = vmax.f32 %v269_v51, 0.0 }
 0x1ca   :  { %v289_v58 = vmax.f32 %v261_v54, 0.0 }
 0x1cb   :  { %v298_v59 = vpack.c.bf16 %v291_v56, %v290_v55 }
 0x1cc   :  { %v297_v61 = vpack.c.bf16 %v289_v58, %v288_v57  ;;  %v411_v62 = vpop.f32.mrb[4].mxu1 }
 0x1cd   :  { %v282_v63 = vadd.f32 %v411_v62, %v183_v60  ;;  %v273_v0 = vpop.f32.mrb[5].mxu1 }
 0x1ce   :  { %v274_v2 = vadd.f32 %v273_v0, %v173_v48  ;;  %v412_v3 = vpop.f32.mrb[6].mxu1  ;;  %414 = vmatpush3.bf16.msra.mxu0 %v297_v61 }
 0x1cf   :  { %v285_v4 = vadd.f32 %v412_v3, %v188_v1  ;;  %v276_v5 = vpop.f32.mrb[7].mxu1  ;;  %415 = vmatprep.subr.bf16.mxu0 %v467_v40  ;;  %v294_v7 = vmax.f32 %v282_v63, 0.0 }
 0x1d0   :  { %v277_v6 = vadd.f32 %v276_v5, %v178_v53  ;;  %v292_v9 = vmax.f32 %v274_v2, 0.0 }
 0x1d1   :  { %v295_v8 = vmax.f32 %v285_v4, 0.0 }
 0x1d2   :  { %v293_v10 = vmax.f32 %v277_v6, 0.0  ;;  %416 = vmatpush3.bf16.msra.mxu0 %v298_v59 }
 0x1d3   :  { %v300_v11 = vpack.c.bf16 %v295_v8, %v294_v7  ;;  %417 = vmatprep.subr.bf16.mxu0 %v467_v40 }
 0x1d4   :  { %v299_v12 = vpack.c.bf16 %v293_v10, %v292_v9 }
 0x1d6   :  { %418 = vmatpush3.bf16.msra.mxu0 %v299_v12 }
 0x1d7   :  { %419 = vmatprep.subr.bf16.mxu0 %v467_v40 }
 0x1da   :  { %420 = vmatpush3.bf16.msra.mxu0 %v300_v11 }
 0x1dd   :  { %422 = vmatmul.mubr.msk.bf16.vlgmr.msra.gmra.mrb[4].mxu0 %vm303_vm3, %v296_v13 }
 0x2b0   :  { %v341_v15 = vpop.f32.mrb[4].mxu0 }
 0x2b1   :  { %v342_v16 = vadd.f32 %v341_v15, %v302_v14  ;;  %v423_v17 = vpop.f32.mrb[5].mxu0 }
 0x2b2   :  { %v344_v18 = vpop.f32.mrb[6].mxu0 }
 0x2b3   :  { %v347_v19 = vsub.f32 0.0, %v342_v16  ;;  %v424_v20 = vpop.f32.mrb[7].mxu0 }
 0x2b5   :  { %v348_v21 = vmul.f32 1.442695, %v347_v19 }
 0x2b7   :  { %438 = vpow2.f32 %v348_v21 }
 0x2c1   :  { %v439_v22 = vpop.eup %438 }
 0x2c2   :  { %v350_v23 = vadd.f32 1.0, %v439_v22 }
 0x2c4   :  { %440 = vrcp.f32 %v350_v23 }
 0x2ce   :  { %v441_v24 = vpop.eup %440 }
 0x2cf   :  { %353 = vst.msk [vmem:[#allocation3] sm:$0x1] %vm352_vm4, %v441_v24 }
 0x2d0   :  { %453 = shalt.err (!%p450_p4)
}
 0x2d1   :  { %s454_s1 = scalar_lea.hbm %s600_s7, 16 }
 0x2d2   :  { %p455_p5 = scmp.ne.s32.totalorder %s600_s7, %s454_s1  ;;  %p458_p6 = scmp.lt.u32.totalorder %s454_s1, %s600_s7 }
 0x2d4   :  { %p460_p7 = pnand %p458_p6, %p455_p5 }
 0x2d6   :  { %463 = shalt.err (!%p460_p7)
}
 0x2d7   :  { %363 = dma.vmem_to_hbm [thread:$0]  %s361_s15, 16, %s600_s7, [#allocation4]  }
 0x2d8   :  { %464 = dma.done.wait [#allocation4], 16  }
 0x2d9   :  { %465 = vsyncadd [#allocation4], 4294967280 }
 0x2da   :  { %367 = vsyncpa [#allocation4], 1 }

</bundles_post_ra>
